<compile_context>
chip_gen: v7x
topology: tpu7x:2x2x1
jax: 0.10.0
libtpu: 0.0.40
codegen_flags: <defaults>
</compile_context>

<pallas_src>
import jax
import jax.numpy as jnp
from jax.experimental import pallas as pl
from jax.experimental.pallas import tpu as pltpu


def _select_last_kernel(x_ref, o_ref):
    # x_ref arrives already squeezed to (tb, th): straight copy.
    o_ref[...] = x_ref[...]


def _pick_tile(dim, unit, cap):
    """Largest multiple of `unit` (<= cap) that evenly divides `dim`,
    falling back to the full dim when it is not a multiple of `unit`
    (full-extent blocks are always legal w.r.t. the (8,128) constraint)."""
    if dim % unit != 0:
        return dim
    t = min(dim, cap)
    t = (t // unit) * unit
    while dim % t != 0:
        t -= unit
    return t


def select_item(inputs, item_index):
    """Pallas equivalent of SelectItem(item_index)(inputs) == inputs[item_index][-1]."""
    x = inputs[item_index]          # tuple selection: plain-Python glue
    L, B, H = x.shape

    th = _pick_tile(H, 128, 1024)   # lane-axis tile (lane-dense when H % 128 == 0)
    tb = _pick_tile(B, 8, 512)      # sublane-axis tile
    grid = (B // tb, H // th)

    itemsize = jnp.dtype(x.dtype).itemsize

    return pl.pallas_call(
        _select_last_kernel,
        out_shape=jax.ShapeDtypeStruct((B, H), x.dtype),
        grid_spec=pltpu.PrefetchScalarGridSpec(
            num_scalar_prefetch=0,
            grid=grid,
            # Only the last leading slice (block index L-1) is ever fetched;
            # the leading axis is squeezed away inside the kernel.
            in_specs=[
                pl.BlockSpec(
                    (pl.Squeezed(), tb, th),
                    lambda i, j: (L - 1, i, j),
                )
            ],
            out_specs=pl.BlockSpec((tb, th), lambda i, j: (i, j)),
        ),
        compiler_params=pltpu.CompilerParams(
            dimension_semantics=("parallel", "parallel"),
        ),
        cost_estimate=pl.CostEstimate(
            flops=0,
            transcendentals=0,
            bytes_accessed=2 * B * H * itemsize,
        ),
    )(x)


if __name__ == "__main__":
    key = jax.random.PRNGKey(0)
    k0, k1, k2 = jax.random.split(key, 3)

    # --- small shapes consistent with the RNN module's forward ---
    seq, batch, hidden, num_layers = 8, 2, 32, 2

    # Synthetic RNN-style output tuple: (output, h_n)
    output = jax.random.normal(k0, (seq, batch, hidden), dtype=jnp.float32)
    h_n = jax.random.normal(k1, (num_layers, batch, hidden), dtype=jnp.float32)
    inputs = (output, h_n)

    # SelectItem(1): inputs[1][-1] -> last-layer hidden state, shape (batch, hidden)
    got = jax.block_until_ready(select_item(inputs, 1))
    expected = inputs[1][-1]
    assert got.shape == expected.shape and got.dtype == expected.dtype
    assert jnp.allclose(got, expected), "mismatch vs reference slice (item 1)"

    # SelectItem(0): last time-step of the RNN output.
    got0 = jax.block_until_ready(select_item(inputs, 0))
    assert jnp.allclose(got0, inputs[0][-1]), "mismatch vs reference slice (item 0)"

    # Extra check exercising the tiled, lane-dense path (H % 128 == 0, B % 8 == 0).
    big = jax.random.normal(k2, (4, 8, 256), dtype=jnp.float32)
    got_big = jax.block_until_ready(select_item((big,), 0))
    assert jnp.allclose(got_big, big[-1]), "mismatch vs reference slice (tiled path)"

    print("KERNEL_OK")
</pallas_src>

<mosaic_0001>
module attributes {stable_mosaic.version = 11 : i64} {
  func.func @_select_last_kernel(%arg0: i32, %arg1: i32, %arg2: memref<1x2x32xf32, #tpu.memory_space<vmem>>, %arg3: memref<2x32xf32, #tpu.memory_space<vmem>>) attributes {dimension_semantics = [#tpu.dimension_semantics<parallel>, #tpu.dimension_semantics<parallel>], iteration_bounds = array<i64: 1, 1>, scalar_prefetch = 0 : i64, scratch_operands = 0 : i64, tpu.core_type = #tpu.core_type<tc>, window_params = [{transform_indices = @transform_0, window_bounds = array<i64: 1, 2, 32>}, {transform_indices = @transform_1, window_bounds = array<i64: 2, 32>}]} {
    %c0 = arith.constant 0 : index
    %c0_0 = arith.constant 0 : index
    %c0_1 = arith.constant 0 : index
    %0 = vector.load %arg2[%c0, %c0_0, %c0_1] : memref<1x2x32xf32, #tpu.memory_space<vmem>>, vector<1x2x32xf32>
    %1 = vector.shape_cast %0 : vector<1x2x32xf32> to vector<2x32xf32>
    %c0_2 = arith.constant 0 : index
    %c0_3 = arith.constant 0 : index
    %2 = vector.load %arg3[%c0_2, %c0_3] : memref<2x32xf32, #tpu.memory_space<vmem>>, vector<2x32xf32>
    tpu.vector_store %arg3[%c0_2, %c0_3], %1 {strides = array<i32>} : memref<2x32xf32, #tpu.memory_space<vmem>>, vector<2x32xf32>,
    return
  }
  func.func @transform_0(%arg0: i32, %arg1: i32) -> (i32, i32, i32) {
    %c1_i32 = arith.constant 1 : i32
    %c0_i32 = arith.constant 0 : i32
    return %c1_i32, %arg0, %arg1 : i32, i32, i32
  }
  func.func @transform_1(%arg0: i32, %arg1: i32) -> (i32, i32) {
    %c0_i32 = arith.constant 0 : i32
    return %arg0, %arg1 : i32, i32
  }
}

</mosaic_0001>

<bundles_post_ra>
// kernel: tpu_custom_call.1
= control target key start
LH: loop header
LB: loop body
LE: loop exit
PB: predicated region body
PF: predicated region fallthrough
CT: control target
= control target key end

     0   :  { %6 = vsyncpa [#allocation3], 0  ;;  %s126_s0 = inlined_call_operand.hbm [shape: f32[2,2,32], index: 0, kind: input, shape index: {}]   ;;  %s127_s1 = inlined_call_operand.hbm [shape: f32[2,32], index: 1, kind: output, shape index: {}]  }
   0x1   :  { %7 = vsyncpa [#allocation4], 0  ;;  %s13_s8 = scalar_lea.hbm %s126_s0, 32  ;;  %s93_s9 = smov [#allocation2]  }
   0x2   :  { %s15_s10 = sshll.u32 %s93_s9, 4  ;;  %s66_s13 = scalar_lea.hbm %s126_s0, 64  ;;  %s16_s10 = int_to_ptr.vmem [resolvable:$true] %s15_s10 }
   0x3   :  { %p43_p0 = scmp.ne.s32.totalorder %s13_s8, %s66_s13  ;;  %p45_p1 = scmp.lt.u32.totalorder %s13_s8, %s126_s0 }
   0x4   :  { %p46_p2 = scmp.lt.u32.totalorder %s66_s13, %s66_s13  ;;  %p48_p4 = scmp.lt.u32.totalorder %s66_s13, %s13_s8 }
   0x6   :  { %p47_p3 = por %p46_p2, %p45_p1 }
   0x8   :  { %p49_p5 = por %p48_p4, %p47_p3 }
   0xa   :  { %p50_p6 = pnand %p49_p5, %p43_p0 }
   0xc   :  { %53 = shalt.err (!%p50_p6)
}
   0xd   :  { %s54_s16 = scalar_lea.vmem %s16_s10, 32  ;;  %p59_p8 = scmp.lt.s32.totalorder %s16_s10, %s16_s10 }
   0xe   :  { %p55_p7 = scmp.ne.s32.totalorder %s16_s10, %s54_s16  ;;  %p60_p9 = scmp.lt.s32.totalorder %s54_s16, %s54_s16 }
  0x10   :  { %p61_p10 = por %p60_p9, %p59_p8 }
  0x12   :  { %p62_p11 = pnand %p61_p10, %p55_p7 }
  0x14   :  { %65 = shalt.err (!%p62_p11)
}
  0x15   :  { %18 = dma.hbm_to_vmem [thread:$0]  %s13_s8, 32, %s16_s10, [#allocation3]  }
  0x16   :  { %89 = dma.done.wait [#allocation3], 32  }
  0x17   :  { %90 = vsyncadd [#allocation3], 4294967264  ;;  %s94_s17 = smov [#allocation5]   ;;  %vm23_vm0 = vcmask 254976   ;;  %v22_v0 = vld [vmem:[#allocation2] sm:$0x3] }
  0x18   :  { %s31_s18 = sshll.u32 %s94_s17, 4  ;;  %24 = vst.msk [vmem:[#allocation5] sm:$0x3] %vm23_vm0, %v22_v0  ;;  %s32_s18 = int_to_ptr.vmem [resolvable:$true] %s31_s18 }
  0x19   :  { %s67_s0 = scalar_lea.vmem %s32_s18, 32  ;;  %p72_p13 = scmp.lt.s32.totalorder %s32_s18, %s32_s18 }
  0x1a   :  { %p68_p12 = scmp.ne.s32.totalorder %s32_s18, %s67_s0  ;;  %p73_p0 = scmp.lt.s32.totalorder %s67_s0, %s67_s0 }
  0x1c   :  { %p74_p1 = por %p73_p0, %p72_p13 }
  0x1e   :  { %p75_p2 = pnand %p74_p1, %p68_p12 }
  0x20   :  { %78 = shalt.err (!%p75_p2)
}
  0x21   :  { %s79_s21 = scalar_lea.hbm %s127_s1, 32 }
  0x22   :  { %p80_p3 = scmp.ne.s32.totalorder %s127_s1, %s79_s21  ;;  %p83_p4 = scmp.lt.u32.totalorder %s79_s21, %s127_s1 }
  0x24   :  { %p85_p5 = pnand %p83_p4, %p80_p3 }
  0x26   :  { %88 = shalt.err (!%p85_p5)
}
  0x27   :  { %34 = dma.vmem_to_hbm [thread:$0]  %s32_s18, 32, %s127_s1, [#allocation4]  }
  0x28   :  { %91 = dma.done.wait [#allocation4], 32  }
  0x29   :  { %92 = vsyncadd [#allocation4], 4294967264 }
  0x2a   :  { %38 = vsyncpa [#allocation3], 1 }
  0x2b   :  { %39 = vsyncpa [#allocation4], 1 }

</bundles_post_ra>
